<compile_context>
chip_gen: v7x
topology: tpu7x:2x2x1
jax: 0.10.0
libtpu: 0.0.40
codegen_flags: <defaults>
</compile_context>

<pallas_src>
import jax
import jax.numpy as jnp
from jax.experimental import pallas as pl
from jax.experimental.pallas import tpu as pltpu


_VMEM_LIMIT_BYTES = 32 * 1024 * 1024
_MIN_SPLIT_BYTES = 4 * 1024 * 1024          # only force a multi-step grid above this
_RAGGED_BLOCK_BYTES = 512 * 1024            # conservative block size for the 1-D path


def _h_swish_kernel(x_ref, o_ref):
    x = x_ref[...]
    # h_swish(x) = x * relu6(x + 3) / 6 = x * clip(x + 3, 0, 6) * (1/6)
    hs = jnp.clip(x + 3.0, 0.0, 6.0) * (1.0 / 6.0)
    o_ref[...] = (x * hs).astype(o_ref.dtype)


def _sublane_multiple(dtype) -> int:
    # Native sublane tile per dtype: (8,128) f32, (16,128) bf16, (32,128) fp8.
    itemsize = jnp.dtype(dtype).itemsize
    return {4: 8, 2: 16, 1: 32}.get(itemsize, 8)


def _num_tensorcores() -> int:
    """Best-effort TensorCore count of the local chip (megacore parts -> 2)."""
    try:
        kind = jax.devices()[0].device_kind.lower()
    except Exception:
        return 1
    if any(tag in kind for tag in ("v7", "v5p", "v4")):
        return 2
    return 1


def _choose_lane_width(n: int, sub: int):
    """Widest lane width W (multiple of 128) such that W divides n exactly.

    Prefers widths whose row count is also a multiple of the sublane tile so
    every store is unmasked.  Returns None when n is not a multiple of 128
    (-> pad-free 1-D fallback path).
    """
    widths = (8192, 4096, 2048, 1024, 512, 256, 128)
    for W in widths:
        if n % W == 0 and (n // W) % sub == 0:
            return W
    for W in widths:
        if n % W == 0:
            return W
    return None


def _cost_estimate(n: int, itemsize: int) -> pl.CostEstimate:
    return pl.CostEstimate(flops=5 * n, transcendentals=0,
                           bytes_accessed=2 * n * itemsize)


def _compiler_params() -> pltpu.CompilerParams:
    return pltpu.CompilerParams(
        dimension_semantics=("parallel",),
        vmem_limit_bytes=_VMEM_LIMIT_BYTES,
    )


def _h_swish_2d(slab: jax.Array, *, target_block_bytes: int, donate_input: bool):
    rows, W = slab.shape
    dtype = slab.dtype
    itemsize = jnp.dtype(dtype).itemsize
    sub = _sublane_multiple(dtype)
    n = rows * W

    # ~target_block_bytes per input block, rounded to the dtype sublane tile.
    row_bytes = W * itemsize
    target_rows = max(1, target_block_bytes // row_bytes)
    block_rows = max(sub, (target_rows // sub) * sub)

    # Megacore (v7x): guarantee >= 4 grid steps (>= 2 per TensorCore) once the
    # tensor is large enough that the extra ~0.35us/step is noise.  Single-TC
    # chips (v5e/v6e) never take this path.
    min_steps = 4 if (_num_tensorcores() > 1 and n * itemsize >= _MIN_SPLIT_BYTES) else 1
    if min_steps > 1 and rows > min_steps * sub:
        cap = pl.cdiv(pl.cdiv(rows, min_steps), sub) * sub
        block_rows = min(block_rows, max(sub, cap))

    block_rows = min(block_rows, rows)        # == rows (full dim) is always legal
    if block_rows < rows and block_rows % sub != 0:
        block_rows = max(sub, (block_rows // sub) * sub)

    grid_steps = pl.cdiv(rows, block_rows)
    # Keep the step count even on 2-TC parts so the cores stay balanced.
    if min_steps > 1 and grid_steps > 1 and grid_steps % 2 == 1:
        alt = max(sub, pl.cdiv(pl.cdiv(rows, grid_steps + 1), sub) * sub)
        if pl.cdiv(rows, alt) % 2 == 0:
            block_rows = alt
            grid_steps = pl.cdiv(rows, block_rows)

    extra = {"input_output_aliases": {0: 0}} if donate_input else {}

    return pl.pallas_call(
        _h_swish_kernel,
        out_shape=jax.ShapeDtypeStruct((rows, W), dtype),
        grid_spec=pltpu.PrefetchScalarGridSpec(
            num_scalar_prefetch=0,
            grid=(grid_steps,),
            in_specs=[pl.BlockSpec((block_rows, W), lambda i: (i, 0))],
            out_specs=pl.BlockSpec((block_rows, W), lambda i: (i, 0)),
        ),
        compiler_params=_compiler_params(),
        cost_estimate=_cost_estimate(n, itemsize),
        **extra,
    )(slab)


def _h_swish_1d(flat: jax.Array, *, donate_input: bool):
    """Pad-free fallback for element counts that are not a multiple of 128.

    One call over the flat array; the boundary block is masked by Pallas, so
    no padded HBM copy and no output slice are needed.
    """
    (n,) = flat.shape
    dtype = flat.dtype
    itemsize = jnp.dtype(dtype).itemsize
    unit = _sublane_multiple(dtype) * 128     # one full native tile worth of elements

    if n <= unit:
        block_len = n                         # single full-extent block, unmasked
    else:
        target_elems = max(unit, _RAGGED_BLOCK_BYTES // itemsize)
        block_len = max(unit, (min(target_elems, n) // unit) * unit)
        if _num_tensorcores() > 1 and n * itemsize >= _MIN_SPLIT_BYTES:
            cap = max(unit, pl.cdiv(pl.cdiv(n, 4), unit) * unit)
            block_len = min(block_len, cap)
    grid_steps = pl.cdiv(n, block_len)

    extra = {"input_output_aliases": {0: 0}} if donate_input else {}

    return pl.pallas_call(
        _h_swish_kernel,
        out_shape=jax.ShapeDtypeStruct((n,), dtype),
        grid_spec=pltpu.PrefetchScalarGridSpec(
            num_scalar_prefetch=0,
            grid=(grid_steps,),
            in_specs=[pl.BlockSpec((block_len,), lambda i: (i,))],
            out_specs=pl.BlockSpec((block_len,), lambda i: (i,)),
        ),
        compiler_params=_compiler_params(),
        cost_estimate=_cost_estimate(n, itemsize),
        **extra,
    )(flat)


def h_swish(x: jax.Array, *, target_block_bytes: int = 4 * 1024 * 1024,
            donate_input: bool = False) -> jax.Array:
    """Elementwise h_swish; any shape in, same shape/dtype out (float dtypes)."""
    if not jnp.issubdtype(x.dtype, jnp.floating):
        raise TypeError("h_swish Pallas kernel supports floating-point inputs only.")
    orig_shape = x.shape
    n = x.size
    if n == 0:
        return x

    flat = x.reshape(-1)                      # contiguous -> layout bitcast, no copy
    W = _choose_lane_width(n, _sublane_multiple(x.dtype))
    if W is not None:
        out = _h_swish_2d(flat.reshape(n // W, W),
                          target_block_bytes=target_block_bytes,
                          donate_input=donate_input)
    else:
        out = _h_swish_1d(flat, donate_input=donate_input)
    return out.reshape(orig_shape)


if __name__ == "__main__":
    key = jax.random.PRNGKey(0)

    # NCHW activation, small MobileNet-like shape (zero-copy 2-D slab path).
    x = jax.random.normal(key, (2, 4, 16, 16), dtype=jnp.float32) * 4.0
    y = jax.block_until_ready(h_swish(x))
    ref = x * jnp.clip(x + 3.0, 0.0, 6.0) / 6.0
    assert y.shape == x.shape and y.dtype == x.dtype
    assert jnp.allclose(y, ref, rtol=1e-6, atol=1e-6), "mismatch vs reference (f32)"

    # Ragged element count (not a multiple of 128) -> pad-free masked 1-D path.
    x2 = jax.random.normal(jax.random.PRNGKey(1), (3, 5, 7, 11), dtype=jnp.float32) * 4.0
    y2 = jax.block_until_ready(h_swish(x2))
    ref2 = x2 * jnp.clip(x2 + 3.0, 0.0, 6.0) / 6.0
    assert y2.shape == x2.shape
    assert jnp.allclose(y2, ref2, rtol=1e-6, atol=1e-6), "mismatch vs reference (ragged)"

    # bf16 path (native (16,128) sublane tiles).
    x3 = jax.random.normal(jax.random.PRNGKey(2), (2, 8, 16, 16), dtype=jnp.bfloat16) * 4.0
    y3 = jax.block_until_ready(h_swish(x3))
    x3f = x3.astype(jnp.float32)
    ref3 = x3f * jnp.clip(x3f + 3.0, 0.0, 6.0) / 6.0
    assert y3.dtype == jnp.bfloat16
    assert jnp.allclose(y3.astype(jnp.float32), ref3, rtol=5e-2, atol=5e-2), "mismatch (bf16)"

    print("KERNEL_OK")
</pallas_src>

<mosaic_0001>
module attributes {stable_mosaic.version = 11 : i64} {
  func.func @_h_swish_kernel(%arg0: i32, %arg1: memref<8x256xf32, #tpu.memory_space<vmem>>, %arg2: memref<8x256xf32, #tpu.memory_space<vmem>>) attributes {dimension_semantics = [#tpu.dimension_semantics<parallel>], iteration_bounds = array<i64: 1>, scalar_prefetch = 0 : i64, scratch_operands = 0 : i64, tpu.core_type = #tpu.core_type<tc>, window_params = [{transform_indices = @transform_0, window_bounds = array<i64: 8, 256>}, {transform_indices = @transform_1, window_bounds = array<i64: 8, 256>}]} {
    %c0 = arith.constant 0 : index
    %c0_0 = arith.constant 0 : index
    %0 = vector.load %arg1[%c0, %c0_0] : memref<8x256xf32, #tpu.memory_space<vmem>>, vector<8x256xf32>
    %cst = arith.constant 3.000000e+00 : f32
    %1 = vector.broadcast %cst : f32 to vector<8x256xf32>
    %2 = arith.addf %0, %1 : vector<8x256xf32>
    %cst_1 = arith.constant 0.000000e+00 : f32
    %cst_2 = arith.constant 6.000000e+00 : f32
    %3 = vector.broadcast %cst_1 : f32 to vector<8x256xf32>
    %4 = arith.maximumf %3, %2 : vector<8x256xf32>
    %5 = vector.broadcast %cst_2 : f32 to vector<8x256xf32>
    %6 = arith.minimumf %5, %4 : vector<8x256xf32>
    %cst_3 = arith.constant 0.166666672 : f32
    %7 = vector.broadcast %cst_3 : f32 to vector<8x256xf32>
    %8 = arith.mulf %6, %7 : vector<8x256xf32>
    %9 = arith.mulf %0, %8 : vector<8x256xf32>
    %c0_4 = arith.constant 0 : index
    %c0_5 = arith.constant 0 : index
    %10 = vector.load %arg2[%c0_4, %c0_5] : memref<8x256xf32, #tpu.memory_space<vmem>>, vector<8x256xf32>
    tpu.vector_store %arg2[%c0_4, %c0_5], %9 {strides = array<i32>} : memref<8x256xf32, #tpu.memory_space<vmem>>, vector<8x256xf32>,
    return
  }
  func.func @transform_0(%arg0: i32) -> (i32, i32) {
    %c0_i32 = arith.constant 0 : i32
    %c0_i32_0 = arith.constant 0 : i32
    return %arg0, %c0_i32 : i32, i32
  }
  func.func @transform_1(%arg0: i32) -> (i32, i32) {
    %c0_i32 = arith.constant 0 : i32
    %c0_i32_0 = arith.constant 0 : i32
    return %arg0, %c0_i32 : i32, i32
  }
}

</mosaic_0001>

<bundles_post_ra>
// kernel: tpu_custom_call.1
= control target key start
LH: loop header
LB: loop body
LE: loop exit
PB: predicated region body
PF: predicated region fallthrough
CT: control target
= control target key end

     0   :  { %6 = vsyncpa [#allocation3], 0  ;;  %s136_s0 = inlined_call_operand.hbm [shape: f32[8,256], index: 0, kind: input, shape index: {}]   ;;  %s137_s1 = inlined_call_operand.hbm [shape: f32[8,256], index: 1, kind: output, shape index: {}]  }
   0x1   :  { %7 = vsyncpa [#allocation4], 0  ;;  %s100_s6 = smov [#allocation2]   ;;  %s52_s10 = scalar_lea.hbm %s136_s0, 256 }
   0x2   :  { %s14_s7 = sshll.u32 %s100_s6, 4  ;;  %p53_p0 = scmp.ne.s32.totalorder %s136_s0, %s52_s10  ;;  %s15_s7 = int_to_ptr.vmem [resolvable:$true] %s14_s7 }
   0x3   :  { %p56_p1 = scmp.lt.u32.totalorder %s52_s10, %s136_s0 }
   0x5   :  { %p58_p2 = pnand %p56_p1, %p53_p0 }
   0x7   :  { %61 = shalt.err (!%p58_p2)
}
   0x8   :  { %s62_s15 = scalar_lea.vmem %s15_s7, 256  ;;  %p67_p4 = scmp.lt.s32.totalorder %s15_s7, %s15_s7 }
   0x9   :  { %p63_p3 = scmp.ne.s32.totalorder %s15_s7, %s62_s15  ;;  %p68_p5 = scmp.lt.s32.totalorder %s62_s15, %s62_s15 }
   0xb   :  { %p69_p6 = por %p68_p5, %p67_p4 }
   0xd   :  { %p70_p7 = pnand %p69_p6, %p63_p3 }
   0xf   :  { %73 = shalt.err (!%p70_p7)
}
  0x10   :  { %17 = dma.hbm_to_vmem [thread:$0]  %s136_s0, 256, %s15_s7, [#allocation3]  }
  0x11   :  { %96 = dma.done.wait [#allocation3], 256  }
  0x12   :  { %97 = vsyncadd [#allocation3], 4294967040  ;;  %v21_v0 = vld [vmem:[#allocation2] sm:$0xff]  ;;  %v22_v1 = vld [vmem:[#allocation2 + $0x8] sm:$0xff]  ;;  %s101_s18 = smov [#allocation5]  }
  0x13   :  { %v23_v2 = vadd.f32 3.0, %v21_v0  ;;  %v24_v3 = vadd.f32 3.0, %v22_v1  ;;  %s41_s19 = sshll.u32 %s101_s18, 4  ;;  %s42_s19 = int_to_ptr.vmem [resolvable:$true] %s41_s19 }
  0x14   :  { %s74_s0 = scalar_lea.vmem %s42_s19, 256  ;;  %p79_p9 = scmp.lt.s32.totalorder %s42_s19, %s42_s19 }
  0x15   :  { %v25_v4 = vmax.f32 %v23_v2, 0.0  ;;  %v26_v5 = vmax.f32 %v24_v3, 0.0  ;;  %p75_p8 = scmp.ne.s32.totalorder %s42_s19, %s74_s0  ;;  %p80_p10 = scmp.lt.s32.totalorder %s74_s0, %s74_s0 }
  0x17   :  { %v27_v6 = vmin.f32 %v25_v4, 6.0  ;;  %v28_v7 = vmin.f32 %v26_v5, 6.0  ;;  %p81_p11 = por %p80_p10, %p79_p9 }
  0x19   :  { %v29_v8 = vmul.f32 0.16666667, %v27_v6  ;;  %v30_v9 = vmul.f32 0.16666667, %v28_v7  ;;  %p82_p12 = pnand %p81_p11, %p75_p8 }
  0x1b   :  { %v31_v10 = vmul.f32 %v29_v8, %v21_v0  ;;  %v32_v11 = vmul.f32 %v30_v9, %v22_v1 }
  0x1d   :  { %33 = vst [vmem:[#allocation5] sm:$0xff] %v31_v10  ;;  %34 = vst [vmem:[#allocation5 + $0x8] sm:$0xff] %v32_v11 }
  0x1e   :  { %85 = shalt.err (!%p82_p12)
}
  0x1f   :  { %s86_s22 = scalar_lea.hbm %s137_s1, 256 }
  0x20   :  { %p87_p13 = scmp.ne.s32.totalorder %s137_s1, %s86_s22  ;;  %p90_p0 = scmp.lt.u32.totalorder %s86_s22, %s137_s1 }
  0x22   :  { %p92_p1 = pnand %p90_p0, %p87_p13 }
  0x24   :  { %95 = shalt.err (!%p92_p1)
}
  0x25   :  { %44 = dma.vmem_to_hbm [thread:$0]  %s42_s19, 256, %s137_s1, [#allocation4]  }
  0x26   :  { %98 = dma.done.wait [#allocation4], 256  }
  0x27   :  { %99 = vsyncadd [#allocation4], 4294967040 }
  0x28   :  { %48 = vsyncpa [#allocation3], 1 }
  0x29   :  { %49 = vsyncpa [#allocation4], 1 }

</bundles_post_ra>
